<compile_context>
chip_gen: v6e
topology: v6e:2x2x1
jax: 0.10.0
libtpu: 0.0.40
codegen_flags: <defaults>
</compile_context>

<pallas_src>
import jax
import jax.numpy as jnp
from jax.experimental import pallas as pl
from jax.experimental.pallas import tpu as pltpu

D_IN, D_PAD, H, D_OUT = 784, 896, 256, 10   # 896 = 7 * 128


def mlp_kernel(x_ref, w1_ref, b1_ref, w2_ref, b2_ref, w3_ref, b3_ref, o_ref):
    x = x_ref[...]                                              # (TILE_B, 896) bf16

    # layer1 + ReLU  (dropout1 is identity in eval)
    h1 = jnp.dot(x, w1_ref[...], preferred_element_type=jnp.float32) + b1_ref[...]
    h1 = jnp.maximum(h1, 0.0).astype(jnp.bfloat16)

    # layer2 + ReLU  (dropout2 is identity in eval)
    h2 = jnp.dot(h1, w2_ref[...], preferred_element_type=jnp.float32) + b2_ref[...]
    h2 = jnp.maximum(h2, 0.0).astype(jnp.bfloat16)

    # layer3 + log_softmax over dim=1 (feature axis), all in f32
    logits = jnp.dot(h2, w3_ref[...], preferred_element_type=jnp.float32) + b3_ref[...]
    m = jnp.max(logits, axis=-1, keepdims=True)
    shifted = logits - m
    lse = jnp.log(jnp.sum(jnp.exp(shifted), axis=-1, keepdims=True))
    o_ref[...] = shifted - lse


def _round_up(n, m):
    return ((n + m - 1) // m) * m


def mlp_forward(x, params, tile_b=256):
    """x: (B, 1, 28, 28) or (B, 784). Returns (B, 10) log-probabilities."""
    B = x.shape[0]
    x2d = x.reshape(B, -1).astype(jnp.float32)                  # torch x.view(B, -1)
    w1, b1, w2, b2, w3, b3 = params

    # Batch tile: >= 256 for large B (MXU-friendly), clamped (multiple of 8) for small B.
    TILE_B = min(tile_b, _round_up(B, 8))
    Bp = _round_up(B, TILE_B)
    nb = Bp // TILE_B

    # Zero-pad batch rows and the feature dim (784 -> 896); pad rows of w1 with zeros
    # so the result is numerically identical. Cast matmul operands to bf16.
    xp = jnp.pad(x2d, ((0, Bp - B), (0, D_PAD - D_IN))).astype(jnp.bfloat16)
    w1p = jnp.pad(w1, ((0, D_PAD - D_IN), (0, 0))).astype(jnp.bfloat16)
    w2b = w2.astype(jnp.bfloat16)
    w3b = w3.astype(jnp.bfloat16)

    flops = 2 * Bp * (D_PAD * H + H * H + H * D_OUT)
    bytes_accessed = (
        xp.size * 2 + w1p.size * 2 + w2b.size * 2 + w3b.size * 2
        + (b1.size + b2.size + b3.size) * 4 + Bp * D_OUT * 4
    )
    cost = pl.CostEstimate(
        flops=flops,
        transcendentals=Bp * (D_OUT + 1),       # exp per class + log per row
        bytes_accessed=bytes_accessed,
    )

    out = pl.pallas_call(
        mlp_kernel,
        out_shape=jax.ShapeDtypeStruct((Bp, D_OUT), jnp.float32),
        grid=(nb,),
        in_specs=[
            pl.BlockSpec((TILE_B, D_PAD), lambda i: (i, 0)),    # x: batch-tiled stream
            pl.BlockSpec((D_PAD, H), lambda i: (0, 0)),         # weights: VMEM-resident
            pl.BlockSpec((1, H), lambda i: (0, 0)),
            pl.BlockSpec((H, H), lambda i: (0, 0)),
            pl.BlockSpec((1, H), lambda i: (0, 0)),
            pl.BlockSpec((H, D_OUT), lambda i: (0, 0)),
            pl.BlockSpec((1, D_OUT), lambda i: (0, 0)),
        ],
        out_specs=pl.BlockSpec((TILE_B, D_OUT), lambda i: (i, 0)),
        compiler_params=pltpu.CompilerParams(
            dimension_semantics=("parallel",),                  # megacore on v7x
        ),
        cost_estimate=cost,
    )(xp, w1p, b1, w2b, b2, w3b, b3)

    return out[:B]


def init_params(key):
    """Deterministic parameter init matching nn.Linear shapes (stored as (in, out))."""
    k1, k2, k3, k4, k5, k6 = jax.random.split(key, 6)

    def linear(kw, kb, fan_in, fan_out):
        bound = 1.0 / jnp.sqrt(fan_in)
        w = jax.random.uniform(kw, (fan_in, fan_out), jnp.float32, -bound, bound)
        b = jax.random.uniform(kb, (1, fan_out), jnp.float32, -bound, bound)
        return w, b

    w1, b1 = linear(k1, k2, 784, 256)
    w2, b2 = linear(k3, k4, 256, 256)
    w3, b3 = linear(k5, k6, 256, 10)
    return (w1, b1, w2, b2, w3, b3)


def mlp_reference(x, params):
    B = x.shape[0]
    x2d = x.reshape(B, -1).astype(jnp.float32)
    w1, b1, w2, b2, w3, b3 = params
    h1 = jnp.maximum(x2d @ w1 + b1, 0.0)
    h2 = jnp.maximum(h1 @ w2 + b2, 0.0)
    logits = h2 @ w3 + b3
    return jax.nn.log_softmax(logits, axis=1)


if __name__ == "__main__":
    key = jax.random.PRNGKey(0)
    kx, kp = jax.random.split(key)

    # MNIST-like input: batch=2, NCHW (2, 1, 28, 28), flattened to 784 in forward.
    x = jax.random.normal(kx, (2, 1, 28, 28), jnp.float32)
    params = init_params(kp)

    out = mlp_forward(x, params)
    out = jax.block_until_ready(out)

    ref = mlp_reference(x, params)
    assert out.shape == (2, 10)
    # bf16 matmul operands (f32 accumulation) -> loose-but-tight-enough tolerance.
    assert jnp.allclose(out, ref, atol=5e-2, rtol=5e-2)
    # log-probabilities must normalize per row.
    assert jnp.allclose(jnp.sum(jnp.exp(out), axis=1), 1.0, atol=1e-3)

    print("KERNEL_OK")
</pallas_src>

<mosaic_0001>
module attributes {stable_mosaic.version = 11 : i64} {
  func.func @mlp_kernel(%arg0: i32, %arg1: memref<8x896xbf16, #tpu.memory_space<vmem>>, %arg2: memref<896x256xbf16, #tpu.memory_space<vmem>>, %arg3: memref<1x256xf32, #tpu.memory_space<vmem>>, %arg4: memref<256x256xbf16, #tpu.memory_space<vmem>>, %arg5: memref<1x256xf32, #tpu.memory_space<vmem>>, %arg6: memref<256x10xbf16, #tpu.memory_space<vmem>>, %arg7: memref<1x10xf32, #tpu.memory_space<vmem>>, %arg8: memref<8x10xf32, #tpu.memory_space<vmem>>) attributes {dimension_semantics = [#tpu.dimension_semantics<parallel>], iteration_bounds = array<i64: 1>, scalar_prefetch = 0 : i64, scratch_operands = 0 : i64, tpu.core_type = #tpu.core_type<tc>, window_params = [{transform_indices = @transform_0, window_bounds = array<i64: 8, 896>}, {pipeline_mode = #tpu.pipeline_mode<synchronous>, transform_indices = @transform_1, window_bounds = array<i64: 896, 256>}, {pipeline_mode = #tpu.pipeline_mode<synchronous>, transform_indices = @transform_2, window_bounds = array<i64: 1, 256>}, {pipeline_mode = #tpu.pipeline_mode<synchronous>, transform_indices = @transform_3, window_bounds = array<i64: 256, 256>}, {pipeline_mode = #tpu.pipeline_mode<synchronous>, transform_indices = @transform_4, window_bounds = array<i64: 1, 256>}, {pipeline_mode = #tpu.pipeline_mode<synchronous>, transform_indices = @transform_5, window_bounds = array<i64: 256, 10>}, {pipeline_mode = #tpu.pipeline_mode<synchronous>, transform_indices = @transform_6, window_bounds = array<i64: 1, 10>}, {transform_indices = @transform_7, window_bounds = array<i64: 8, 10>}]} {
    %c0 = arith.constant 0 : index
    %c0_0 = arith.constant 0 : index
    %0 = vector.load %arg1[%c0, %c0_0] : memref<8x896xbf16, #tpu.memory_space<vmem>>, vector<8x896xbf16>
    %c0_1 = arith.constant 0 : index
    %c0_2 = arith.constant 0 : index
    %1 = vector.load %arg2[%c0_1, %c0_2] : memref<896x256xbf16, #tpu.memory_space<vmem>>, vector<896x256xbf16>
    %cst = arith.constant dense<0.000000e+00> : vector<8x256xf32>
    %2 = tpu.matmul %0, %1, %cst {dimension_numbers = #tpu.dot_dimension_numbers<[1], [0], [0], [1], [0, 0, 1, 1], [], []>} : vector<8x896xbf16>, vector<896x256xbf16>, vector<8x256xf32> -> vector<8x256xf32>
    %c0_3 = arith.constant 0 : index
    %c0_4 = arith.constant 0 : index
    %3 = vector.load %arg3[%c0_3, %c0_4] : memref<1x256xf32, #tpu.memory_space<vmem>>, vector<1x256xf32>
    %4 = vector.broadcast %3 : vector<1x256xf32> to vector<8x256xf32>
    %5 = arith.addf %2, %4 : vector<8x256xf32>
    %cst_5 = arith.constant 0.000000e+00 : f32
    %6 = vector.broadcast %cst_5 : f32 to vector<8x256xf32>
    %7 = arith.maximumf %5, %6 : vector<8x256xf32>
    %8 = arith.truncf %7 : vector<8x256xf32> to vector<8x256xbf16>
    %c0_6 = arith.constant 0 : index
    %c0_7 = arith.constant 0 : index
    %9 = vector.load %arg4[%c0_6, %c0_7] : memref<256x256xbf16, #tpu.memory_space<vmem>>, vector<256x256xbf16>
    %cst_8 = arith.constant dense<0.000000e+00> : vector<8x256xf32>
    %10 = tpu.matmul %8, %9, %cst_8 {dimension_numbers = #tpu.dot_dimension_numbers<[1], [0], [0], [1], [0, 0, 1, 1], [], []>} : vector<8x256xbf16>, vector<256x256xbf16>, vector<8x256xf32> -> vector<8x256xf32>
    %c0_9 = arith.constant 0 : index
    %c0_10 = arith.constant 0 : index
    %11 = vector.load %arg5[%c0_9, %c0_10] : memref<1x256xf32, #tpu.memory_space<vmem>>, vector<1x256xf32>
    %12 = vector.broadcast %11 : vector<1x256xf32> to vector<8x256xf32>
    %13 = arith.addf %10, %12 : vector<8x256xf32>
    %cst_11 = arith.constant 0.000000e+00 : f32
    %14 = vector.broadcast %cst_11 : f32 to vector<8x256xf32>
    %15 = arith.maximumf %13, %14 : vector<8x256xf32>
    %16 = arith.truncf %15 : vector<8x256xf32> to vector<8x256xbf16>
    %c0_12 = arith.constant 0 : index
    %c0_13 = arith.constant 0 : index
    %17 = vector.load %arg6[%c0_12, %c0_13] : memref<256x10xbf16, #tpu.memory_space<vmem>>, vector<256x10xbf16>
    %cst_14 = arith.constant dense<0.000000e+00> : vector<8x10xf32>
    %18 = tpu.matmul %16, %17, %cst_14 {dimension_numbers = #tpu.dot_dimension_numbers<[1], [0], [0], [1], [0, 0, 1, 1], [], []>} : vector<8x256xbf16>, vector<256x10xbf16>, vector<8x10xf32> -> vector<8x10xf32>
    %c0_15 = arith.constant 0 : index
    %c0_16 = arith.constant 0 : index
    %19 = vector.load %arg7[%c0_15, %c0_16] : memref<1x10xf32, #tpu.memory_space<vmem>>, vector<1x10xf32>
    %20 = vector.broadcast %19 : vector<1x10xf32> to vector<8x10xf32>
    %21 = arith.addf %18, %20 : vector<8x10xf32>
    %cst_17 = arith.constant dense<0xFF800000> : vector<8xf32>
    %22 = vector.multi_reduction <maximumf>, %21, %cst_17 [1] : vector<8x10xf32> to vector<8xf32>
    %23 = vector.shape_cast %22 : vector<8xf32> to vector<8x1xf32>
    %24 = vector.broadcast %23 : vector<8x1xf32> to vector<8x10xf32>
    %25 = arith.subf %21, %24 : vector<8x10xf32>
    %26 = math.exp %25 : vector<8x10xf32>
    %cst_18 = arith.constant dense<0.000000e+00> : vector<8xf32>
    %27 = vector.multi_reduction <add>, %26, %cst_18 [1] : vector<8x10xf32> to vector<8xf32>
    %28 = vector.shape_cast %27 : vector<8xf32> to vector<8x1xf32>
    %29 = math.log %28 : vector<8x1xf32>
    %30 = vector.broadcast %29 : vector<8x1xf32> to vector<8x10xf32>
    %31 = arith.subf %25, %30 : vector<8x10xf32>
    %c0_19 = arith.constant 0 : index
    %c0_20 = arith.constant 0 : index
    %32 = vector.load %arg8[%c0_19, %c0_20] : memref<8x10xf32, #tpu.memory_space<vmem>>, vector<8x10xf32>
    tpu.vector_store %arg8[%c0_19, %c0_20], %31 {strides = array<i32>} : memref<8x10xf32, #tpu.memory_space<vmem>>, vector<8x10xf32>,
    return
  }
  func.func @transform_0(%arg0: i32) -> (i32, i32) {
    %c0_i32 = arith.constant 0 : i32
    %c0_i32_0 = arith.constant 0 : i32
    return %arg0, %c0_i32 : i32, i32
  }
  func.func @transform_1(%arg0: i32) -> (i32, i32) {
    %c0_i32 = arith.constant 0 : i32
    %c0_i32_0 = arith.constant 0 : i32
    %c0_i32_1 = arith.constant 0 : i32
    return %c0_i32, %c0_i32_0 : i32, i32
  }
  func.func @transform_2(%arg0: i32) -> (i32, i32) {
    %c0_i32 = arith.constant 0 : i32
    %c0_i32_0 = arith.constant 0 : i32
    %c0_i32_1 = arith.constant 0 : i32
    return %c0_i32, %c0_i32_0 : i32, i32
  }
  func.func @transform_3(%arg0: i32) -> (i32, i32) {
    %c0_i32 = arith.constant 0 : i32
    %c0_i32_0 = arith.constant 0 : i32
    %c0_i32_1 = arith.constant 0 : i32
    return %c0_i32, %c0_i32_0 : i32, i32
  }
  func.func @transform_4(%arg0: i32) -> (i32, i32) {
    %c0_i32 = arith.constant 0 : i32
    %c0_i32_0 = arith.constant 0 : i32
    %c0_i32_1 = arith.constant 0 : i32
    return %c0_i32, %c0_i32_0 : i32, i32
  }
  func.func @transform_5(%arg0: i32) -> (i32, i32) {
    %c0_i32 = arith.constant 0 : i32
    %c0_i32_0 = arith.constant 0 : i32
    %c0_i32_1 = arith.constant 0 : i32
    return %c0_i32, %c0_i32_0 : i32, i32
  }
  func.func @transform_6(%arg0: i32) -> (i32, i32) {
    %c0_i32 = arith.constant 0 : i32
    %c0_i32_0 = arith.constant 0 : i32
    %c0_i32_1 = arith.constant 0 : i32
    return %c0_i32, %c0_i32_0 : i32, i32
  }
  func.func @transform_7(%arg0: i32) -> (i32, i32) {
    %c0_i32 = arith.constant 0 : i32
    %c0_i32_0 = arith.constant 0 : i32
    return %arg0, %c0_i32 : i32, i32
  }
}

</mosaic_0001>

<bundles_post_ra>
// kernel: tpu_custom_call.1
= control target key start
LH: loop header
LB: loop body
LE: loop exit
PB: predicated region body
PF: predicated region fallthrough
CT: control target
= control target key end

     0   :  { %12 = vsyncpa [#allocation3], 0  ;;  %s2029_s0 = inlined_call_operand.vmem [shape: bf16[8,896], index: 0, kind: input, shape index: {}]   ;;  %s2030_s1 = inlined_call_operand.hbm [shape: bf16[896,256], index: 1, kind: input, shape index: {}]   ;;  %s2031_s2 = inlined_call_operand.vmem [shape: f32[1,256], index: 2, kind: input, shape index: {}]   ;;  %s2032_s3 = inlined_call_operand.hbm [shape: bf16[256,256], index: 3, kind: input, shape index: {}]   ;;  %s2033_s4 = inlined_call_operand.vmem [shape: f32[1,256], index: 4, kind: input, shape index: {}]   ;;  %s2034_s5 = inlined_call_operand.vmem [shape: bf16[256,10], index: 5, kind: input, shape index: {}]   ;;  %s2035_s6 = inlined_call_operand.vmem [shape: f32[1,10], index: 6, kind: input, shape index: {}]   ;;  %s2036_s7 = inlined_call_operand.hbm [shape: f32[8,10], index: 7, kind: output, shape index: {}]  }
   0x1   :  { %13 = vsyncpa [#allocation6], 0 }
   0x2   :  { %14 = vsyncpa [#allocation4], 0  ;;  %s1896_s24 = smov [#allocation2]  }
   0x3   :  { %s22_s25 = sshll.u32 %s1896_s24, 4  ;;  %s23_s25 = int_to_ptr.vmem [resolvable:$true] %s22_s25 }
   0x4   :  { %s1838_s26 = scalar_lea.vmem %s23_s25, 14336  ;;  %p1843_p1 = scmp.lt.s32.totalorder %s23_s25, %s23_s25 }
   0x5   :  { %p1839_p0 = scmp.ne.s32.totalorder %s23_s25, %s1838_s26  ;;  %p1844_p2 = scmp.lt.s32.totalorder %s1838_s26, %s1838_s26 }
   0x7   :  { %p1845_p3 = por %p1844_p2, %p1843_p1 }
   0x9   :  { %p1846_p4 = pnand %p1845_p3, %p1839_p0 }
   0xb   :  { %1849 = shalt.err (!%p1846_p4)
}
   0xc   :  { %s1897_s27 = smov 128   ;;  %s1898_s28 = smov 8  }
   0xd   :  { %28 = dma.hbm_to_vmem [thread:$0]  %s2030_s1, 14336, %s23_s25, [#allocation3], %s1897_s27, %s1897_s27, %s1898_s28  }
   0xe   :  { %s1899_s8 = smov [#allocation5]  }
   0xf   :  { %s36_s9 = sshll.u32 %s1899_s8, 4  ;;  %s37_s9 = int_to_ptr.vmem [resolvable:$true] %s36_s9 }
  0x10   :  { %s1858_s10 = scalar_lea.vmem %s37_s9, 4096  ;;  %p1863_p6 = scmp.lt.s32.totalorder %s37_s9, %s37_s9 }
  0x11   :  { %p1859_p5 = scmp.ne.s32.totalorder %s37_s9, %s1858_s10  ;;  %p1864_p7 = scmp.lt.s32.totalorder %s1858_s10, %s1858_s10 }
  0x13   :  { %p1865_p8 = por %p1864_p7, %p1863_p6 }
  0x15   :  { %p1866_p9 = pnand %p1865_p8, %p1859_p5 }
  0x17   :  { %1869 = shalt.err (!%p1866_p9)
}
  0x18   :  { %42 = dma.hbm_to_vmem [thread:$0]  %s2032_s3, 4096, %s37_s9, [#allocation6], %s1897_s27, %s1897_s27, %s1898_s28  }
  0x19   :  { %1890 = dma.done.wait [#allocation3], 14336  }
  0x1a   :  { %1891 = vsyncadd [#allocation3], 4294952960 }
  0x1b   :  { %1892 = dma.done.wait [#allocation6], 4096  }
  0x1c   :  { %1893 = vsyncadd [#allocation6], 4294963200  ;;  %v1587_v0 = vld [vmem:[#allocation2 + $0x74] ss:$8 sps:$4 sm:$0xff]   ;;  %v1589_v1 = vld [vmem:[#allocation2 + $0x70] ss:$8 sps:$4 sm:$0xff]  }
  0x1d   :  { %769 = vmatprep.subr.bf16.mxu0 %v1587_v0  ;;  %v1590_v2 = vld [vmem:[#allocation2 + $0x174] ss:$8 sps:$4 sm:$0xff]   ;;  %v1592_v3 = vld [vmem:[#allocation2 + $0x170] ss:$8 sps:$4 sm:$0xff]   ;;  %v1593_v4 = vld [vmem:[#allocation2 + $0x64] ss:$8 sps:$4 sm:$0xff]  }
  0x1e   :  { %770 = vmatpush1.bf16.msra.mxu0 %v1589_v1  ;;  %v1595_v5 = vld [vmem:[#allocation2 + $0x60] ss:$8 sps:$4 sm:$0xff]   ;;  %810 = vmatprep.subr.bf16.mxu1 %v1590_v2  ;;  %v1596_v6 = vld [vmem:[#allocation2 + $0x164] ss:$8 sps:$4 sm:$0xff]   ;;  %v1599_v8 = vld [vmem:[#allocation2 + $0x54] ss:$8 sps:$4 sm:$0xff]  }
  0x1f   :  { %811 = vmatpush1.bf16.msra.mxu1 %v1592_v3  ;;  %771 = vmatprep.subr.bf16.mxu0 %v1593_v4  ;;  %v1598_v7 = vld [vmem:[#allocation2 + $0x160] ss:$8 sps:$4 sm:$0xff]   ;;  %v1601_v9 = vld [vmem:[#allocation2 + $0x50] ss:$8 sps:$4 sm:$0xff]   ;;  %v1602_v10 = vld [vmem:[#allocation2 + $0x154] ss:$8 sps:$4 sm:$0xff]  }
  0x20   :  { %812 = vmatprep.subr.bf16.mxu1 %v1596_v6  ;;  %v1605_v11 = vld [vmem:[#allocation2 + $0x44] ss:$8 sps:$4 sm:$0xff]   ;;  %v1604_v12 = vld [vmem:[#allocation2 + $0x150] ss:$8 sps:$4 sm:$0xff]   ;;  %v1607_v14 = vld [vmem:[#allocation2 + $0x40] ss:$8 sps:$4 sm:$0xff]  }
  0x21   :  { %v1608_v13 = vld [vmem:[#allocation2 + $0x144] ss:$8 sps:$4 sm:$0xff]   ;;  %v1611_v15 = vld [vmem:[#allocation2 + $0x34] ss:$8 sps:$4 sm:$0xff]   ;;  %v1610_v16 = vld [vmem:[#allocation2 + $0x140] ss:$8 sps:$4 sm:$0xff]  }
  0x22   :  { %772 = vmatpush1.bf16.msra.mxu0 %v1595_v5  ;;  %v1614_v17 = vld [vmem:[#allocation2 + $0x134] ss:$8 sps:$4 sm:$0xff]   ;;  %v1613_v18 = vld [vmem:[#allocation2 + $0x30] ss:$8 sps:$4 sm:$0xff]   ;;  %v1617_v19 = vld [vmem:[#allocation2 + $0x24] ss:$8 sps:$4 sm:$0xff]  }
  0x23   :  { %773 = vmatprep.subr.bf16.mxu0 %v1599_v8  ;;  %813 = vmatpush1.bf16.msra.mxu1 %v1598_v7  ;;  %v1616_v20 = vld [vmem:[#allocation2 + $0x130] ss:$8 sps:$4 sm:$0xff]   ;;  %v1620_v21 = vld [vmem:[#allocation2 + $0x124] ss:$8 sps:$4 sm:$0xff]   ;;  %v1619_v22 = vld [vmem:[#allocation2 + $0x20] ss:$8 sps:$4 sm:$0xff]  }
  0x24   :  { %814 = vmatprep.subr.bf16.mxu1 %v1602_v10  ;;  %v1623_v23 = vld [vmem:[#allocation2 + $0x14] ss:$8 sps:$4 sm:$0xff]   ;;  %v1622_v24 = vld [vmem:[#allocation2 + $0x120] ss:$8 sps:$4 sm:$0xff]   ;;  %v1625_v26 = vld [vmem:[#allocation2 + $0x10] ss:$8 sps:$4 sm:$0xff]  }
  0x25   :  { %v1626_v25 = vld [vmem:[#allocation2 + $0x114] ss:$8 sps:$4 sm:$0xff]   ;;  %v1629_v27 = vld [vmem:[#allocation2 + $0x4] ss:$8 sps:$4 sm:$0xff]   ;;  %v1628_v28 = vld [vmem:[#allocation2 + $0x110] ss:$8 sps:$4 sm:$0xff]  }
  0x26   :  { %774 = vmatpush1.bf16.msra.mxu0 %v1601_v9  ;;  %v1632_v29 = vld [vmem:[#allocation2 + $0x104] ss:$8 sps:$4 sm:$0xff]   ;;  %v1631_v30 = vld [vmem:[#allocation2] ss:$8 sps:$4 sm:$0xff]   ;;  %v1635_v31 = vld [vmem:[#allocation2 + $0xf4] ss:$8 sps:$4 sm:$0xff]  }
  0x27   :  { %775 = vmatprep.subr.bf16.mxu0 %v1605_v11  ;;  %815 = vmatpush1.bf16.msra.mxu1 %v1604_v12  ;;  %v1634_v32 = vld [vmem:[#allocation2 + $0x100] ss:$8 sps:$4 sm:$0xff]   ;;  %v1638_v33 = vld [vmem:[#allocation2 + $0x1f4] ss:$8 sps:$4 sm:$0xff]   ;;  %v1637_v34 = vld [vmem:[#allocation2 + $0xf0] ss:$8 sps:$4 sm:$0xff]  }
  0x28   :  { %816 = vmatprep.subr.bf16.mxu1 %v1608_v13  ;;  %v1641_v35 = vld [vmem:[#allocation2 + $0xe4] ss:$8 sps:$4 sm:$0xff]   ;;  %v1640_v36 = vld [vmem:[#allocation2 + $0x1f0] ss:$8 sps:$4 sm:$0xff]   ;;  %v1643_v38 = vld [vmem:[#allocation2 + $0xe0] ss:$8 sps:$4 sm:$0xff]  }
  0x29   :  { %v1644_v37 = vld [vmem:[#allocation2 + $0x1e4] ss:$8 sps:$4 sm:$0xff]   ;;  %v1647_v39 = vld [vmem:[#allocation2 + $0xd4] ss:$8 sps:$4 sm:$0xff]   ;;  %v1646_v40 = vld [vmem:[#allocation2 + $0x1e0] ss:$8 sps:$4 sm:$0xff]  }
  0x2a   :  { %776 = vmatpush1.bf16.msra.mxu0 %v1607_v14  ;;  %v1650_v41 = vld [vmem:[#allocation2 + $0x1d4] ss:$8 sps:$4 sm:$0xff]   ;;  %v1649_v42 = vld [vmem:[#allocation2 + $0xd0] ss:$8 sps:$4 sm:$0xff]   ;;  %v1653_v43 = vld [vmem:[#allocation2 + $0xc4] ss:$8 sps:$4 sm:$0xff]  }
  0x2b   :  { %777 = vmatprep.subr.bf16.mxu0 %v1611_v15  ;;  %817 = vmatpush1.bf16.msra.mxu1 %v1610_v16  ;;  %v1652_v44 = vld [vmem:[#allocation2 + $0x1d0] ss:$8 sps:$4 sm:$0xff]   ;;  %v1656_v45 = vld [vmem:[#allocation2 + $0x1c4] ss:$8 sps:$4 sm:$0xff]   ;;  %v1655_v47 = vld [vmem:[#allocation2 + $0xc0] ss:$8 sps:$4 sm:$0xff]  }
  0x2c   :  { %818 = vmatprep.subr.bf16.mxu1 %v1614_v17  ;;  %v56_v46 = vld [vmem:[%s2029_s0] sm:$0xff]  ;;  %v1659_v49 = vld [vmem:[#allocation2 + $0xb4] ss:$8 sps:$4 sm:$0xff]   ;;  %v57_v50 = vld [vmem:[%s2029_s0 + $0x8] sm:$0xff]  ;;  %v1900_v15 = vmov 0   ;;  %vm1361_vm0 = vcmask 80896  }
  0x2d   :  { %v1392_v48 = vcombine.high %v56_v46, %v56_v46  ;;  %v1658_v51 = vld [vmem:[#allocation2 + $0x1c0] ss:$8 sps:$4 sm:$0xff]   ;;  %v1394_v52 = vcombine.high %v57_v50, %v57_v50  ;;  %v1662_v53 = vld [vmem:[#allocation2 + $0x1b4] ss:$8 sps:$4 sm:$0xff]   ;;  %v1661_v54 = vld [vmem:[#allocation2 + $0xb0] ss:$8 sps:$4 sm:$0xff]   ;;  %v1391_v5 = vcombine.low %v56_v46, %v56_v46  ;;  %v1393_v8 = vcombine.low %v57_v50, %v57_v50 }
  0x2e   :  { %778 = vmatpush1.bf16.msra.mxu0 %v1613_v18  ;;  %v1665_v55 = vld [vmem:[#allocation2 + $0xa4] ss:$8 sps:$4 sm:$0xff]   ;;  %v1664_v56 = vld [vmem:[#allocation2 + $0x1b0] ss:$8 sps:$4 sm:$0xff]   ;;  %v1667_v58 = vld [vmem:[#allocation2 + $0xa0] ss:$8 sps:$4 sm:$0xff]  }
  0x2f   :  { %779 = vmatprep.subr.bf16.mxu0 %v1617_v19  ;;  %819 = vmatpush1.bf16.msra.mxu1 %v1616_v20  ;;  %v1668_v57 = vld [vmem:[#allocation2 + $0x1a4] ss:$8 sps:$4 sm:$0xff]   ;;  %v1671_v59 = vld [vmem:[#allocation2 + $0x94] ss:$8 sps:$4 sm:$0xff]   ;;  %v1670_v60 = vld [vmem:[#allocation2 + $0x1a0] ss:$8 sps:$4 sm:$0xff]  }
  0x30   :  { %820 = vmatprep.subr.bf16.mxu1 %v1620_v21  ;;  %801 = vmatprep.mubr.bf16.mxu0 %v1392_v48  ;;  %v1674_v61 = vld [vmem:[#allocation2 + $0x194] ss:$8 sps:$4 sm:$0xff]   ;;  %v1673_v62 = vld [vmem:[#allocation2 + $0x90] ss:$8 sps:$4 sm:$0xff]   ;;  %v1677_v63 = vld [vmem:[#allocation2 + $0x84] ss:$8 sps:$4 sm:$0xff]  }
  0x31   :  { %842 = vmatprep.mubr.bf16.mxu1 %v1394_v52  ;;  %v1676_v0 = vld [vmem:[#allocation2 + $0x190] ss:$8 sps:$4 sm:$0xff]   ;;  %v1680_v1 = vld [vmem:[#allocation2 + $0x184] ss:$8 sps:$4 sm:$0xff]   ;;  %v1679_v2 = vld [vmem:[#allocation2 + $0x80] ss:$8 sps:$4 sm:$0xff]  }
  0x32   :  { %780 = vmatpush1.bf16.msra.mxu0 %v1619_v22  ;;  %v1687_v3 = vld [vmem:[#allocation2 + $0x274] ss:$8 sps:$4 sm:$0xff]   ;;  %v1684_v4 = vld [vmem:[#allocation2 + $0x180] ss:$8 sps:$4 sm:$0xff]   ;;  %v1685_v7 = vld [vmem:[#allocation2 + $0x270] ss:$8 sps:$4 sm:$0xff]  }
  0x33   :  { %781 = vmatprep.subr.bf16.mxu0 %v1623_v23  ;;  %821 = vmatpush1.bf16.msra.mxu1 %v1622_v24  ;;  %v1713_v6 = vld [vmem:[#allocation2 + $0x374] ss:$8 sps:$4 sm:$0xff]   ;;  %v1692_v9 = vld [vmem:[#allocation2 + $0x264] ss:$8 sps:$4 sm:$0xff]   ;;  %v1711_v10 = vld [vmem:[#allocation2 + $0x370] ss:$8 sps:$4 sm:$0xff]  }
  0x34   :  { %822 = vmatprep.subr.bf16.mxu1 %v1626_v25  ;;  %v1719_v11 = vld [vmem:[#allocation2 + $0x364] ss:$8 sps:$4 sm:$0xff]   ;;  %v1690_v12 = vld [vmem:[#allocation2 + $0x260] ss:$8 sps:$4 sm:$0xff]   ;;  %v1695_v13 = vld [vmem:[#allocation2 + $0x254] ss:$8 sps:$4 sm:$0xff]  }
  0x35   :  { %v1717_v14 = vld [vmem:[#allocation2 + $0x360] ss:$8 sps:$4 sm:$0xff]   ;;  %v1725_v16 = vld [vmem:[#allocation2 + $0x354] ss:$8 sps:$4 sm:$0xff]   ;;  %v1693_v17 = vld [vmem:[#allocation2 + $0x250] ss:$8 sps:$4 sm:$0xff]  }
  0x36   :  { %782 = vmatpush1.bf16.msra.mxu0 %v1625_v26  ;;  %v1698_v18 = vld [vmem:[#allocation2 + $0x244] ss:$8 sps:$4 sm:$0xff]   ;;  %v1696_v19 = vld [vmem:[#allocation2 + $0x240] ss:$8 sps:$4 sm:$0xff]   ;;  %v1723_v20 = vld [vmem:[#allocation2 + $0x350] ss:$8 sps:$4 sm:$0xff]  }
  0x37   :  { %783 = vmatprep.subr.bf16.mxu0 %v1629_v27  ;;  %823 = vmatpush1.bf16.msra.mxu1 %v1628_v28  ;;  %v1731_v21 = vld [vmem:[#allocation2 + $0x344] ss:$8 sps:$4 sm:$0xff]   ;;  %v1701_v22 = vld [vmem:[#allocation2 + $0x234] ss:$8 sps:$4 sm:$0xff]   ;;  %v1729_v23 = vld [vmem:[#allocation2 + $0x340] ss:$8 sps:$4 sm:$0xff]  }
  0x38   :  { %824 = vmatprep.subr.bf16.mxu1 %v1632_v29  ;;  %v1737_v24 = vld [vmem:[#allocation2 + $0x334] ss:$8 sps:$4 sm:$0xff]   ;;  %v1699_v26 = vld [vmem:[#allocation2 + $0x230] ss:$8 sps:$4 sm:$0xff]   ;;  %v1704_v28 = vld [vmem:[#allocation2 + $0x224] ss:$8 sps:$4 sm:$0xff]  }
  0x39   :  { %v1957_v25 = vld [vmem:[%s2029_s0 + $0x10] sm:$0xff]  ;;  %v1734_v48 = vld [vmem:[#allocation2 + $0x2c4] ss:$8 sps:$4 sm:$0xff]  }
  0x3a   :  { %784 = vmatpush1.bf16.msra.mxu0 %v1631_v30  ;;  %v1396_v27 = vcombine.high %v1957_v25, %v1957_v25  ;;  %v1735_v29 = vld [vmem:[#allocation2 + $0x330] ss:$8 sps:$4 sm:$0xff]   ;;  %v1743_v30 = vld [vmem:[#allocation2 + $0x324] ss:$8 sps:$4 sm:$0xff]   ;;  %v1728_v46 = vld [vmem:[#allocation2 + $0x2d4] ss:$8 sps:$4 sm:$0xff]  }
  0x3b   :  { %785 = vmatprep.subr.bf16.mxu0 %v1635_v31  ;;  %825 = vmatpush1.bf16.msra.mxu1 %v1634_v32  ;;  %v1702_v31 = vld [vmem:[#allocation2 + $0x220] ss:$8 sps:$4 sm:$0xff]   ;;  %v1707_v32 = vld [vmem:[#allocation2 + $0x214] ss:$8 sps:$4 sm:$0xff]   ;;  %v1746_v52 = vld [vmem:[#allocation2 + $0x2a4] ss:$8 sps:$4 sm:$0xff]  }
  0x3c   :  { %826 = vmatprep.subr.bf16.mxu1 %v1638_v33  ;;  %v1741_v33 = vld [vmem:[#allocation2 + $0x320] ss:$8 sps:$4 sm:$0xff]   ;;  %v1740_v50 = vld [vmem:[#allocation2 + $0x2b4] ss:$8 sps:$4 sm:$0xff]  }
  0x3e   :  { %786 = vmatpush2.bf16.msra.mxu0 %v1637_v34  ;;  %v1749_v34 = vld [vmem:[#allocation2 + $0x314] ss:$8 sps:$4 sm:$0xff]  }
  0x3f   :  { %787 = vmatprep.subr.bf16.mxu0 %v1641_v35  ;;  %827 = vmatpush2.bf16.msra.mxu1 %v1640_v36  ;;  %v1705_v35 = vld [vmem:[#allocation2 + $0x210] ss:$8 sps:$4 sm:$0xff]   ;;  %v1710_v36 = vld [vmem:[#allocation2 + $0x204] ss:$8 sps:$4 sm:$0xff]  }
  0x40   :  { %828 = vmatprep.subr.bf16.mxu1 %v1644_v37  ;;  %v1747_v37 = vld [vmem:[#allocation2 + $0x310] ss:$8 sps:$4 sm:$0xff]  }
  0x42   :  { %788 = vmatpush2.bf16.msra.mxu0 %v1643_v38  ;;  %v1755_v38 = vld [vmem:[#allocation2 + $0x304] ss:$8 sps:$4 sm:$0xff]  }
  0x43   :  { %789 = vmatprep.subr.bf16.mxu0 %v1647_v39  ;;  %829 = vmatpush2.bf16.msra.mxu1 %v1646_v40  ;;  %v1708_v39 = vld [vmem:[#allocation2 + $0x200] ss:$8 sps:$4 sm:$0xff]   ;;  %v1716_v40 = vld [vmem:[#allocation2 + $0x2f4] ss:$8 sps:$4 sm:$0xff]  }
  0x44   :  { %830 = vmatprep.subr.bf16.mxu1 %v1650_v41  ;;  %v1753_v41 = vld [vmem:[#allocation2 + $0x300] ss:$8 sps:$4 sm:$0xff]  }
  0x46   :  { %790 = vmatpush2.bf16.msra.mxu0 %v1649_v42  ;;  %v1714_v42 = vld [vmem:[#allocation2 + $0x2f0] ss:$8 sps:$4 sm:$0xff]  }
  0x47   :  { %791 = vmatprep.subr.bf16.mxu0 %v1653_v43  ;;  %831 = vmatpush2.bf16.msra.mxu1 %v1652_v44  ;;  %v1722_v43 = vld [vmem:[#allocation2 + $0x2e4] ss:$8 sps:$4 sm:$0xff]   ;;  %v1759_v44 = vld [vmem:[%s2029_s0 + $0x18] ss:$0 sps:$4 sm:$0xff]  }
  0x48   :  { %832 = vmatprep.subr.bf16.mxu1 %v1656_v45  ;;  %v1720_v45 = vld [vmem:[#allocation2 + $0x2e0] ss:$8 sps:$4 sm:$0xff]  }
  0x4a   :  { %792 = vmatpush2.bf16.msra.mxu0 %v1655_v47  ;;  %v1726_v47 = vld [vmem:[#allocation2 + $0x2d0] ss:$8 sps:$4 sm:$0xff]  }
  0x4b   :  { %793 = vmatprep.subr.bf16.mxu0 %v1659_v49  ;;  %833 = vmatpush2.bf16.msra.mxu1 %v1658_v51  ;;  %v1732_v49 = vld [vmem:[#allocation2 + $0x2c0] ss:$8 sps:$4 sm:$0xff]   ;;  %v1738_v51 = vld [vmem:[#allocation2 + $0x2b0] ss:$8 sps:$4 sm:$0xff]  }
  0x4c   :  { %834 = vmatprep.subr.bf16.mxu1 %v1662_v53  ;;  %v1744_v53 = vld [vmem:[#allocation2 + $0x2a0] ss:$8 sps:$4 sm:$0xff]  }
  0x4e   :  { %794 = vmatpush2.bf16.msra.mxu0 %v1661_v54  ;;  %v1752_v54 = vld [vmem:[#allocation2 + $0x294] ss:$8 sps:$4 sm:$0xff]  }
  0x4f   :  { %795 = vmatprep.subr.bf16.mxu0 %v1665_v55  ;;  %835 = vmatpush2.bf16.msra.mxu1 %v1664_v56  ;;  %v1750_v55 = vld [vmem:[#allocation2 + $0x290] ss:$8 sps:$4 sm:$0xff]   ;;  %v1758_v56 = vld [vmem:[#allocation2 + $0x284] ss:$8 sps:$4 sm:$0xff]  }
  0x50   :  { %836 = vmatprep.subr.bf16.mxu1 %v1668_v57  ;;  %v1756_v57 = vld [vmem:[#allocation2 + $0x280] ss:$8 sps:$4 sm:$0xff]  }
  0x52   :  { %796 = vmatpush2.bf16.msra.mxu0 %v1667_v58  ;;  %v1395_v58 = vcombine.low %v1957_v25, %v1957_v25  ;;  %v1809_v25 = vld [vmem:[#allocation5 + $0x84] ss:$8 sps:$4 sm:$0xff]  }
  0x53   :  { %797 = vmatprep.subr.bf16.mxu0 %v1671_v59  ;;  %837 = vmatpush2.bf16.msra.mxu1 %v1670_v60  ;;  %v1762_v59 = vld [vmem:[#allocation5 + $0x70] ss:$8 sps:$4 sm:$0xff]   ;;  %v1764_v60 = vld [vmem:[#allocation5 + $0x74] ss:$8 sps:$4 sm:$0xff]  }
  0x54   :  { %838 = vmatprep.subr.bf16.mxu1 %v1674_v61  ;;  %v1767_v61 = vld [vmem:[#allocation5 + $0x64] ss:$8 sps:$4 sm:$0xff]  }
  0x56   :  { %798 = vmatpush2.bf16.msra.mxu0 %v1673_v62  ;;  %v1765_v62 = vld [vmem:[#allocation5 + $0x60] ss:$8 sps:$4 sm:$0xff]  }
  0x57   :  { %799 = vmatprep.subr.bf16.mxu0 %v1677_v63  ;;  %839 = vmatpush2.bf16.msra.mxu1 %v1676_v0  ;;  %v1770_v63 = vld [vmem:[#allocation5 + $0x54] ss:$8 sps:$4 sm:$0xff]   ;;  %v1768_v0 = vld [vmem:[#allocation5 + $0x50] ss:$8 sps:$4 sm:$0xff]  }
  0x58   :  { %840 = vmatprep.subr.bf16.mxu1 %v1680_v1  ;;  %v1773_v1 = vld [vmem:[#allocation5 + $0x44] ss:$8 sps:$4 sm:$0xff]  }
  0x5a   :  { %800 = vmatpush2.bf16.msra.mxu0 %v1679_v2  ;;  %v1771_v2 = vld [vmem:[#allocation5 + $0x40] ss:$8 sps:$4 sm:$0xff]  }
  0x5b   :  { %851 = vmatprep.subr.bf16.mxu0 %v1687_v3  ;;  %841 = vmatpush2.bf16.msra.mxu1 %v1684_v4  ;;  %v1776_v3 = vld [vmem:[#allocation5 + $0x34] ss:$8 sps:$4 sm:$0xff]   ;;  %v1774_v4 = vld [vmem:[#allocation5 + $0x30] ss:$8 sps:$4 sm:$0xff]  }
  0x5c   :  { %892 = vmatprep.subr.bf16.mxu1 %v1713_v6  ;;  %v1777_v6 = vld [vmem:[#allocation5 + $0x20] ss:$8 sps:$4 sm:$0xff]  }
  0x5d   :  { %802 = vmatmul.mubr.bf16.vlgmr.msra.gmra.mxu0 %v1391_v5  ;;  %v1779_v5 = vld [vmem:[#allocation5 + $0x24] ss:$8 sps:$4 sm:$0xff]  }
  0x5e   :  { %852 = vmatpush1.bf16.msra.mxu0 %v1685_v7  ;;  %843 = vmatmul.mubr.bf16.vlgmr.msra.gmra.mxu1 %v1393_v8  ;;  %v1782_v7 = vld [vmem:[#allocation5 + $0x14] ss:$8 sps:$4 sm:$0xff]   ;;  %v1780_v8 = vld [vmem:[#allocation5 + $0x10] ss:$8 sps:$4 sm:$0xff]  }
  0x5f   :  { %853 = vmatprep.subr.bf16.mxu0 %v1692_v9  ;;  %893 = vmatpush1.bf16.msra.mxu1 %v1711_v10  ;;  %v1785_v9 = vld [vmem:[#allocation5 + $0x4] ss:$8 sps:$4 sm:$0xff]   ;;  %v1783_v10 = vld [vmem:[#allocation5] ss:$8 sps:$4 sm:$0xff]  }
  0x60   :  { %924 = vmatprep.mubr.bf16.mxu1 %v1900_v15  ;;  %894 = vmatprep.subr.bf16.mxu1 %v1719_v11  ;;  %v1788_v11 = vld [vmem:[#allocation5 + $0xf4] ss:$8 sps:$4 sm:$0xff]  }
  0x61   :  { %883 = vmatprep.mubr.bf16.mxu0 %v1396_v27  ;;  %v1794_v15 = vld [vmem:[#allocation5 + $0xd4] ss:$8 sps:$4 sm:$0xff]  }
  0x62   :  { %854 = vmatpush1.bf16.msra.mxu0 %v1690_v12  ;;  %v1786_v12 = vld [vmem:[#allocation5 + $0xf0] ss:$8 sps:$4 sm:$0xff]  }
  0x63   :  { %855 = vmatprep.subr.bf16.mxu0 %v1695_v13  ;;  %895 = vmatpush1.bf16.msra.mxu1 %v1717_v14  ;;  %v1791_v13 = vld [vmem:[#allocation5 + $0xe4] ss:$8 sps:$4 sm:$0xff]   ;;  %v1789_v14 = vld [vmem:[#allocation5 + $0xe0] ss:$8 sps:$4 sm:$0xff]   ;;  %v1810_v27 = vld [vmem:[%s2034_s5 + $0x78] sm:$0xff]  }
  0x64   :  { %896 = vmatprep.subr.bf16.mxu1 %v1725_v16  ;;  %v1792_v16 = vld [vmem:[#allocation5 + $0xd0] ss:$8 sps:$4 sm:$0xff]  }
  0x66   :  { %856 = vmatpush1.bf16.msra.mxu0 %v1693_v17  ;;  %v1797_v17 = vld [vmem:[#allocation5 + $0xc4] ss:$8 sps:$4 sm:$0xff]  }
  0x67   :  { %857 = vmatprep.subr.bf16.mxu0 %v1698_v18  ;;  %897 = vmatpush1.bf16.msra.mxu1 %v1723_v20  ;;  %v1795_v18 = vld [vmem:[#allocation5 + $0xc0] ss:$8 sps:$4 sm:$0xff]   ;;  %v1798_v20 = vld [vmem:[#allocation5 + $0xb0] ss:$8 sps:$4 sm:$0xff]  }
  0x68   :  { %898 = vmatprep.subr.bf16.mxu1 %v1731_v21  ;;  %v1803_v21 = vld [vmem:[#allocation5 + $0xa4] ss:$8 sps:$4 sm:$0xff]  }
  0x6a   :  { %858 = vmatpush1.bf16.msra.mxu0 %v1696_v19  ;;  %v1800_v19 = vld [vmem:[#allocation5 + $0xb4] ss:$8 sps:$4 sm:$0xff]  }
  0x6b   :  { %859 = vmatprep.subr.bf16.mxu0 %v1701_v22  ;;  %899 = vmatpush1.bf16.msra.mxu1 %v1729_v23  ;;  %v1801_v22 = vld [vmem:[#allocation5 + $0xa0] ss:$8 sps:$4 sm:$0xff]   ;;  %v1806_v23 = vld [vmem:[#allocation5 + $0x94] ss:$8 sps:$4 sm:$0xff]  }
  0x6c   :  { %900 = vmatprep.subr.bf16.mxu1 %v1737_v24  ;;  %v1804_v24 = vld [vmem:[#allocation5 + $0x90] ss:$8 sps:$4 sm:$0xff]  }
  0x6e   :  { %860 = vmatpush1.bf16.msra.mxu0 %v1699_v26  ;;  %v1807_v26 = vld [vmem:[#allocation5 + $0x80] ss:$8 sps:$4 sm:$0xff]  }
  0x6f   :  { %861 = vmatprep.subr.bf16.mxu0 %v1704_v28  ;;  %901 = vmatpush1.bf16.msra.mxu1 %v1735_v29  ;;  %v1811_v28 = vld [vmem:[%s2034_s5 + $0x38] sm:$0xff]   ;;  %v1812_v29 = vld [vmem:[%s2034_s5 + $0x70] sm:$0xff]  }
  0x70   :  { %902 = vmatprep.subr.bf16.mxu1 %v1743_v30  ;;  %v1813_v30 = vld [vmem:[%s2034_s5 + $0x30] sm:$0xff]  }
  0x72   :  { %862 = vmatpush1.bf16.msra.mxu0 %v1702_v31  ;;  %v1814_v31 = vld [vmem:[%s2034_s5 + $0x68] sm:$0xff]  }
  0x73   :  { %863 = vmatprep.subr.bf16.mxu0 %v1707_v32  ;;  %903 = vmatpush1.bf16.msra.mxu1 %v1741_v33  ;;  %v1815_v32 = vld [vmem:[%s2034_s5 + $0x28] sm:$0xff]   ;;  %v1816_v33 = vld [vmem:[%s2034_s5 + $0x60] sm:$0xff]  }
  0x74   :  { %904 = vmatprep.subr.bf16.mxu1 %v1749_v34  ;;  %v1817_v34 = vld [vmem:[%s2034_s5 + $0x20] sm:$0xff]  }
  0x76   :  { %864 = vmatpush1.bf16.msra.mxu0 %v1705_v35  ;;  %v1818_v35 = vld [vmem:[%s2034_s5 + $0x58] sm:$0xff]  }
  0x77   :  { %865 = vmatprep.subr.bf16.mxu0 %v1710_v36  ;;  %905 = vmatpush1.bf16.msra.mxu1 %v1747_v37  ;;  %v1819_v36 = vld [vmem:[%s2034_s5 + $0x18] sm:$0xff]   ;;  %v1820_v37 = vld [vmem:[%s2034_s5 + $0x50] sm:$0xff]  }
  0x78   :  { %906 = vmatprep.subr.bf16.mxu1 %v1755_v38  ;;  %v1821_v38 = vld [vmem:[%s2034_s5 + $0x10] sm:$0xff]  }
  0x7a   :  { %866 = vmatpush1.bf16.msra.mxu0 %v1708_v39 }
  0x7b   :  { %867 = vmatprep.subr.bf16.mxu0 %v1716_v40  ;;  %907 = vmatpush1.bf16.msra.mxu1 %v1753_v41 }
  0x7c   :  { %1141 = vmatprep.subr.bf16.mxu1 %v1764_v60 }
  0x7e   :  { %868 = vmatpush2.bf16.msra.mxu0 %v1714_v42  ;;  %925 = vmatmul.mubr.bf16.vlgmr.msra.gmra.mxu1 %v1759_v44 }
  0x7f   :  { %869 = vmatprep.subr.bf16.mxu0 %v1722_v43  ;;  %1142 = vmatpush1.bf16.msra.mxu1 %v1762_v59 }
  0x80   :  { %1143 = vmatprep.subr.bf16.mxu1 %v1767_v61 }
  0x82   :  { %870 = vmatpush2.bf16.msra.mxu0 %v1720_v45 }
  0x83   :  { %871 = vmatprep.subr.bf16.mxu0 %v1728_v46  ;;  %1144 = vmatpush1.bf16.msra.mxu1 %v1765_v62 }
  0x84   :  { %1145 = vmatprep.subr.bf16.mxu1 %v1770_v63 }
  0x86   :  { %872 = vmatpush2.bf16.msra.mxu0 %v1726_v47 }
  0x87   :  { %873 = vmatprep.subr.bf16.mxu0 %v1734_v48  ;;  %1146 = vmatpush1.bf16.msra.mxu1 %v1768_v0 }
  0x88   :  { %1147 = vmatprep.subr.bf16.mxu1 %v1773_v1 }
  0x8a   :  { %874 = vmatpush2.bf16.msra.mxu0 %v1732_v49 }
  0x8b   :  { %875 = vmatprep.subr.bf16.mxu0 %v1740_v50  ;;  %1148 = vmatpush1.bf16.msra.mxu1 %v1771_v2 }
  0x8c   :  { %1149 = vmatprep.subr.bf16.mxu1 %v1776_v3 }
  0x8e   :  { %876 = vmatpush2.bf16.msra.mxu0 %v1738_v51  ;;  %v174_v51 = vlaneseq }
  0x8f   :  { %877 = vmatprep.subr.bf16.mxu0 %v1746_v52  ;;  %1150 = vmatpush1.bf16.msra.mxu1 %v1774_v4 }
  0x90   :  { %1151 = vmatprep.subr.bf16.mxu1 %v1779_v5  ;;  %v175_v52 = vshrl.u32 %v174_v51, 7 }
  0x92   :  { %878 = vmatpush2.bf16.msra.mxu0 %v1744_v53  ;;  %v176_v53 = vsub.s32 0, %v175_v52 }
  0x93   :  { %879 = vmatprep.subr.bf16.mxu0 %v1752_v54  ;;  %1152 = vmatpush1.bf16.msra.mxu1 %v1777_v6  ;;  %v172_v54 = vld [vmem:[%s2031_s2] sm:$0x3] }
  0x94   :  { %1153 = vmatprep.subr.bf16.mxu1 %v1782_v7 }
  0x96   :  { %880 = vmatpush2.bf16.msra.mxu0 %v1750_v55  ;;  %v180_v55 = vsub.s32 1, %v175_v52 }
  0x97   :  { %881 = vmatprep.subr.bf16.mxu0 %v1758_v56  ;;  %1154 = vmatpush1.bf16.msra.mxu1 %v1780_v8  ;;  %v177_v56 = vrot.slane %v172_v54, %v176_v53 }
  0x98   :  { %1155 = vmatprep.subr.bf16.mxu1 %v1785_v9 }
  0x9a   :  { %882 = vmatpush2.bf16.msra.mxu0 %v1756_v57  ;;  %v181_v57 = vrot.slane %v172_v54, %v180_v55 }
  0x9b   :  { %1156 = vmatpush1.bf16.msra.mxu1 %v1783_v10  ;;  %1559 = vmatprep.subr.bf16.mxu0 %v1810_v27  ;;  %v1822_v10 = vld [vmem:[%s2034_s5 + $0x48] sm:$0xff]  }
  0x9c   :  { %1157 = vmatprep.subr.bf16.mxu1 %v1788_v11  ;;  %v1823_v11 = vld [vmem:[%s2034_s5 + $0x8] sm:$0xff]  }
  0x9d   :  { %884 = vmatmul.mubr.bf16.vlgmr.msra.gmra.mxu0 %v1395_v58 }
  0x9e   :  { %1560 = vmatpush3.bf16.msra.mxu0 %v1811_v28 }
  0x9f   :  { %1158 = vmatpush2.bf16.msra.mxu1 %v1786_v12  ;;  %1561 = vmatprep.subr.bf16.mxu0 %v1812_v29  ;;  %v1824_v12 = vld [vmem:[%s2034_s5 + $0x40] sm:$0xff]  }
  0xa0   :  { %1159 = vmatprep.subr.bf16.mxu1 %v1791_v13  ;;  %v1825_v13 = vld [vmem:[%s2034_s5] sm:$0xff]  }
  0xa1   :  { %v1542_v29 = vld [vmem:[%s2035_s6] ss:$0 sm:$0xff] }
  0xa2   :  { %1562 = vmatpush3.bf16.msra.mxu0 %v1813_v30 }
  0xa3   :  { %1160 = vmatpush2.bf16.msra.mxu1 %v1789_v14  ;;  %1563 = vmatprep.subr.bf16.mxu0 %v1814_v31  ;;  %v969_v14 = vld [vmem:[%s2033_s4] sm:$0x3]  ;;  %s1901_s4 = smov [#allocation7]  }
  0xa4   :  { %1161 = vmatprep.subr.bf16.mxu1 %v1794_v15  ;;  %v974_v15 = vrot.slane %v969_v14, %v176_v53  ;;  %s1381_s6 = sshll.u32 %s1901_s4, 4  ;;  %s1382_s6 = int_to_ptr.vmem [resolvable:$true] %s1381_s6 }
  0xa5   :  { %s1870_s28 = scalar_lea.vmem %s1382_s6, 128  ;;  %p1875_p11 = scmp.lt.s32.totalorder %s1382_s6, %s1382_s6 }
  0xa6   :  { %1564 = vmatpush3.bf16.msra.mxu0 %v1815_v32  ;;  %p1871_p10 = scmp.ne.s32.totalorder %s1382_s6, %s1870_s28  ;;  %p1876_p12 = scmp.lt.s32.totalorder %s1870_s28, %s1870_s28 }
  0xa7   :  { %1162 = vmatpush2.bf16.msra.mxu1 %v1792_v16  ;;  %1565 = vmatprep.subr.bf16.mxu0 %v1816_v33  ;;  %v978_v16 = vrot.slane %v969_v14, %v180_v55 }
  0xa8   :  { %1163 = vmatprep.subr.bf16.mxu1 %v1797_v17  ;;  %p1877_p13 = por %p1876_p12, %p1875_p11 }
  0xaa   :  { %1566 = vmatpush3.bf16.msra.mxu0 %v1817_v34  ;;  %p1878_p0 = pnand %p1877_p13, %p1871_p10 }
  0xab   :  { %1164 = vmatpush2.bf16.msra.mxu1 %v1795_v18  ;;  %1567 = vmatprep.subr.bf16.mxu0 %v1818_v35 }
  0xac   :  { %1165 = vmatprep.subr.bf16.mxu1 %v1800_v19 }
  0xae   :  { %1568 = vmatpush3.bf16.msra.mxu0 %v1819_v36 }
  0xaf   :  { %1166 = vmatpush2.bf16.msra.mxu1 %v1798_v20  ;;  %1569 = vmatprep.subr.bf16.mxu0 %v1820_v37 }
  0xb0   :  { %1167 = vmatprep.subr.bf16.mxu1 %v1803_v21 }
  0xb2   :  { %1570 = vmatpush3.bf16.msra.mxu0 %v1821_v38 }
  0xb3   :  { %1168 = vmatpush2.bf16.msra.mxu1 %v1801_v22  ;;  %1571 = vmatprep.subr.bf16.mxu0 %v1822_v10 }
  0xb4   :  { %1169 = vmatprep.subr.bf16.mxu1 %v1806_v23 }
  0xb6   :  { %1572 = vmatpush3.bf16.msra.mxu0 %v1823_v11 }
  0xb7   :  { %1170 = vmatpush2.bf16.msra.mxu1 %v1804_v24  ;;  %1573 = vmatprep.subr.bf16.mxu0 %v1824_v12 }
  0xb8   :  { %1171 = vmatprep.subr.bf16.mxu1 %v1809_v25 }
  0xba   :  { %1574 = vmatpush3.bf16.msra.mxu0 %v1825_v13 }
  0xbb   :  { %1172 = vmatpush2.bf16.msra.mxu1 %v1807_v26 }
 0x11d   :  { %v803_v39 = vpop.f32.mrf.mxu0 }
 0x11e   :  { %v844_v41 = vpop.f32.mrf.mxu1  ;;  %v804_v58 = vadd.f32 %v803_v39, %v177_v56 }
 0x11f   :  { %v805_v40 = vpop.f32.mrf.mxu0 }
 0x120   :  { %v846_v43 = vpop.f32.mrf.mxu1  ;;  %v806_v59 = vadd.f32 %v805_v40, %v181_v57  ;;  %v845_v60 = vadd.f32 %v844_v41, %v804_v58 }
 0x121   :  { %v807_v42 = vpop.f32.mrf.mxu0 }
 0x122   :  { %v848_v45 = vpop.f32.mrf.mxu1  ;;  %v847_v62 = vadd.f32 %v846_v43, %v806_v59 }
 0x123   :  { %v808_v44 = vpop.f32.mrf.mxu0 }
 0x124   :  { %v849_v46 = vpop.f32.mrf.mxu1 }
 0x13e   :  { %v926_v47 = vpop.f32.mrf.mxu1 }
 0x140   :  { %v928_v48 = vpop.f32.mrf.mxu1 }
 0x142   :  { %v930_v49 = vpop.f32.mrf.mxu1 }
 0x144   :  { %v931_v50 = vpop.f32.mrf.mxu1 }
 0x15d   :  { %v885_v61 = vpop.f32.mrf.mxu0 }
 0x15e   :  { %v886_v63 = vadd.f32 %v885_v61, %v845_v60 }
 0x15f   :  { %v887_v0 = vpop.f32.mrf.mxu0 }
 0x160   :  { %v927_v1 = vadd.f32 %v926_v47, %v886_v63  ;;  %v888_v2 = vadd.f32 %v887_v0, %v847_v62 }
 0x161   :  { %v889_v3 = vpop.f32.mrf.mxu0 }
 0x162   :  { %v929_v4 = vadd.f32 %v928_v48, %v888_v2  ;;  %v933_v5 = vmax.f32 %v927_v1, 0.0 }
 0x163   :  { %v890_v6 = vpop.f32.mrf.mxu0 }
 0x164   :  { %v934_v7 = vmax.f32 %v929_v4, 0.0  ;;  %v935_v9 = vpack.c.bf16 %v933_v5, %v933_v5 }
 0x166   :  { %v936_v8 = vpack.c.bf16 %v934_v7, %v934_v7 }
 0x168   :  { %1173 = vmatprep.mubr.bf16.mxu1 %v936_v8 }
 0x169   :  { %1174 = vmatmul.mubr.bf16.vlgmr.msra.gmra.mxu1 %v935_v9 }
 0x229   :  { %v1175_v17 = vpop.f32.mrf.mxu1 }
 0x22a   :  { %v1176_v18 = vadd.f32 %v1175_v17, %v974_v15 }
 0x22b   :  { %v1177_v19 = vpop.f32.mrf.mxu1 }
 0x22c   :  { %v1178_v20 = vadd.f32 %v1177_v19, %v978_v16  ;;  %v1182_v21 = vmax.f32 %v1176_v18, 0.0 }
 0x22d   :  { %v1179_v22 = vpop.f32.mrf.mxu1 }
 0x22e   :  { %v1183_v23 = vmax.f32 %v1178_v20, 0.0  ;;  %v1184_v26 = vpack.c.bf16 %v1182_v21, %v1182_v21 }
 0x22f   :  { %v1180_v24 = vpop.f32.mrf.mxu1 }
 0x230   :  { %v1185_v25 = vpack.c.bf16 %v1183_v23, %v1183_v23 }
 0x232   :  { %1353 = vmatprep.mubr.bf16.mxu0 %v1185_v25 }
 0x233   :  { %1354 = vmatmul.mubr.bf16.vlgmr.msra.gmra.mxu0 %v1184_v26 }
 0x2f3   :  { %v1575_v27 = vpop.f32.mrf.mxu0 }
 0x2f5   :  { %v1576_v28 = vpop.f32.mrf.mxu0 }
 0x2f6   :  { %v1577_v30 = vadd.f32 %v1576_v28, %v1575_v27 }
 0x2f7   :  { %v1578_v31 = vpop.f32.mrf.mxu0 }
 0x2f8   :  { %v1356_v32 = vadd.f32 %v1577_v30, %v1542_v29 }
 0x2f9   :  { %v1579_v33 = vpop.f32.mrf.mxu0 }
 0x2fa   :  { %v1362_v34 = vsel %vm1361_vm0, %v1356_v32, -inf }
 0x2fb   :  { %1363 = vmax.xlane.f32.xlu0 %v1362_v34 }
 0x384   :  { %v1364_v35 = vpop.xlane.xlu0 %1363 }
 0x385   :  { %v1365_v36 = vsub.f32 %v1356_v32, %v1364_v35 }
 0x387   :  { %v1366_v37 = vmul.f32 1.442695, %v1365_v36 }
 0x389   :  { %1826 = vpow2.f32 %v1366_v37 }
 0x396   :  { %v1827_v38 = vpop.eup %1826 }
 0x397   :  { %v1368_v39 = vsel %vm1361_vm0, %v1827_v38, 0.0 }
 0x398   :  { %1369 = vadd.xlane.f32.xlu0 %v1368_v39 }
 0x421   :  { %v1370_v40 = vpop.xlane.xlu0 %1369 }
 0x422   :  { %1828 = vlog2.f32 %v1370_v40 }
 0x42f   :  { %v1829_v41 = vpop.eup %1828 }
 0x430   :  { %v1372_v42 = vmul.f32 0.6931472, %v1829_v41 }
 0x432   :  { %v1373_v43 = vsub.f32 %v1365_v36, %v1372_v42 }
 0x434   :  { %1374 = vst.msk [vmem:[#allocation7] sm:$0xff] %vm1361_vm0, %v1373_v43 }
 0x435   :  { %1881 = shalt.err (!%p1878_p0)
}
 0x436   :  { %1384 = dma.vmem_to_hbm [thread:$0]  %s1382_s6, 128, %s2036_s7, [#allocation4]  }
 0x437   :  { %1894 = dma.done.wait [#allocation4], 128  }
 0x438   :  { %1895 = vsyncadd [#allocation4], 4294967168 }
 0x439   :  { %1388 = vsyncpa [#allocation3], 1 }
 0x43a   :  { %1389 = vsyncpa [#allocation6], 1 }
 0x43b   :  { %1390 = vsyncpa [#allocation4], 1 }

</bundles_post_ra>
